<compile_context>
chip_gen: v6e
topology: v6e:2x2x1
jax: 0.10.0
libtpu: 0.0.40
codegen_flags: <defaults>
</compile_context>

<pallas_src>
import jax
import jax.numpy as jnp
from jax.experimental import pallas as pl
from jax.experimental.pallas import tpu as pltpu

CLIP_SCALING = 0.2
INIT_SCALING = -5.0
NORM_EPS = 1e-12

_N_SCAL = 3    # columns 0:3 of the packed output
_N_ROT = 4     # columns 3:7 of the packed output
_PACKED = 8    # 3 + 4 padded up to 8 lanes (column 7 is zero)
_MIB = 1024 * 1024


def _round_up(n, m):
    return ((n + m - 1) // m) * m


def _vmem_capacity_bytes(default=64 * _MIB):
    """Physical per-core VMEM, with a conservative fallback."""
    try:
        info = pltpu.get_tpu_info()
        cap = getattr(info, "vmem_capacity_bytes", None)
        if cap:
            return int(cap)
    except Exception:
        pass
    return default


# ---------------------------------------------------------------------------
# Kernel
# ---------------------------------------------------------------------------
def gslayer_kernel(x_ref, w_ref, b_ref, out_ref):
    """One fused (tm, H) @ (H, 8) matmul + packed epilogue, f32 throughout."""
    # Single MXU pass for both heads, f32 accumulation, one bias broadcast.
    z = jnp.dot(x_ref[...], w_ref[...],
                preferred_element_type=jnp.float32) + b_ref[...]

    # Column masks over the 8 packed lanes (no lane data movement needed).
    col = jax.lax.broadcasted_iota(jnp.int32, z.shape, 1)
    is_scal = col < _N_SCAL
    is_rot = jnp.logical_and(col >= _N_SCAL, col < _N_SCAL + _N_ROT)

    # scaling head: trunc_exp forward == exp, then clamp to [0, 0.2].
    s = jnp.clip(jnp.exp(z), 0.0, CLIP_SCALING)

    # rotation head: L2 normalize over the 4 rotation lanes.
    # One EUP rsqrt per row instead of sqrt + divide (F.normalize semantics:
    # denom = max(norm, eps)  <->  rsqrt(max(sum_sq, eps^2))).
    r2 = jnp.where(is_rot, z * z, 0.0)
    sum_r2 = jnp.sum(r2, axis=-1, keepdims=True)             # (tm, 1)
    inv = jax.lax.rsqrt(jnp.maximum(sum_r2, NORM_EPS * NORM_EPS))
    r = z * inv

    out = jnp.where(is_scal, s, jnp.where(is_rot, r, 0.0))
    out_ref[...] = out.astype(out_ref.dtype)


# ---------------------------------------------------------------------------
# Parameter fusion (do this ONCE, not per forward call)
# ---------------------------------------------------------------------------
def make_fused_params(ws, bs, wr, br, dtype=jnp.float32):
    """Fuse the scaling (H,3) and rotation (H,4) heads into one (H,8) weight
    and one (1,8) f32 bias (column 7 is zero padding).  `dtype` is the weight
    dtype and should match the dtype x arrives in (f32 or bf16)."""
    H = ws.shape[0]
    w = jnp.zeros((H, _PACKED), jnp.float32)
    w = w.at[:, 0:_N_SCAL].set(ws.astype(jnp.float32))
    w = w.at[:, _N_SCAL:_N_SCAL + _N_ROT].set(wr.astype(jnp.float32))
    b = jnp.zeros((1, _PACKED), jnp.float32)
    b = b.at[:, 0:_N_SCAL].set(bs.reshape(1, _N_SCAL).astype(jnp.float32))
    b = b.at[:, _N_SCAL:_N_SCAL + _N_ROT].set(
        br.reshape(1, _N_ROT).astype(jnp.float32))
    return w.astype(dtype), b      # bias stays f32 (added to the f32 acc)


# ---------------------------------------------------------------------------
# Forward
# ---------------------------------------------------------------------------
def gslayer_forward(x, w_fused, b_fused, *, tm=2048, vmem_budget_bytes=None):
    """GSLayer forward.

    x        : (N, H) activations, f32 or bf16 (no cast is done here — feed
               bf16 only if the producer already emits bf16).
    w_fused  : (H, 8) fused weight from make_fused_params (same dtype as x).
    b_fused  : (1, 8) f32 fused bias.
    Returns {"scaling": (N,3) f32, "rotation": (N,4) f32}.
    """
    N, H = x.shape
    if w_fused.dtype != x.dtype:           # tiny (H, 8) cast only
        w_fused = w_fused.astype(x.dtype)
    in_bytes = jnp.dtype(x.dtype).itemsize

    # ---- generation-aware VMEM budget for the double-buffered x tile ------
    cap = _vmem_capacity_bytes()
    if vmem_budget_bytes is None:
        # ~1/3 of physical VMEM: ~21 MiB on v7x (64 MiB), ~42 MiB on v5e/v6e.
        vmem_budget_bytes = max(8 * _MIB, min(48 * _MIB, cap // 3))
    vmem_limit = max(16 * _MIB, min(cap - 8 * _MIB, vmem_budget_bytes + 16 * _MIB))

    # ---- tile sizing -------------------------------------------------------
    # 2 * tm * H * itemsize (double-buffered x tile) must fit the budget.
    max_tm_vmem = max(16, (vmem_budget_bytes // (2 * H * in_bytes)) // 16 * 16)
    # Keep >= 2 grid steps when N allows so both v7x TensorCores get work.
    half_n = _round_up((N + 1) // 2, 16)
    tm = max(16, min(int(tm) // 16 * 16, max_tm_vmem, half_n))

    grid = (pl.cdiv(N, tm),)   # ragged final block handled by Pallas masking

    packed = pl.pallas_call(
        gslayer_kernel,
        out_shape=jax.ShapeDtypeStruct((N, _PACKED), jnp.float32),
        grid_spec=pltpu.PrefetchScalarGridSpec(
            num_scalar_prefetch=0,
            grid=grid,
            in_specs=[
                pl.BlockSpec((tm, H), lambda i: (i, 0)),        # x (streamed)
                pl.BlockSpec((H, _PACKED), lambda i: (0, 0)),   # fused W (resident)
                pl.BlockSpec((1, _PACKED), lambda i: (0, 0)),   # fused bias (resident)
            ],
            out_specs=pl.BlockSpec((tm, _PACKED), lambda i: (i, 0)),
        ),
        compiler_params=pltpu.CompilerParams(
            dimension_semantics=("parallel",),
            vmem_limit_bytes=int(vmem_limit)),
    )(x, w_fused, b_fused)

    return {
        "scaling": packed[:, 0:_N_SCAL],
        "rotation": packed[:, _N_SCAL:_N_SCAL + _N_ROT],
    }


def gslayer_forward_from_heads(x, ws, bs, wr, br, **kw):
    """Convenience: fuse per call (prefer make_fused_params once at init)."""
    w, b = make_fused_params(ws, bs, wr, br, dtype=x.dtype)
    return gslayer_forward(x, w, b, **kw)


# ---------------------------------------------------------------------------
# Init + pure-JAX reference
# ---------------------------------------------------------------------------
def init_params(key, hidden_dim):
    """Deterministic init mirroring GSLayer.__init__ (nn.Linear default init
    with bias overrides for the 'scaling' and 'rotation' heads)."""
    k1, k2, k3 = jax.random.split(key, 3)
    bound = 1.0 / jnp.sqrt(hidden_dim)
    ws = jax.random.uniform(k1, (hidden_dim, 3), jnp.float32, -bound, bound)
    bs = jnp.full((1, 3), INIT_SCALING, jnp.float32)
    wr = jax.random.uniform(k2, (hidden_dim, 4), jnp.float32, -bound, bound)
    br = jax.random.uniform(k3, (1, 4), jnp.float32, -bound, bound)
    br = br.at[0, 0].set(1.0)
    return ws, bs, wr, br


def reference_forward(x, ws, bs, wr, br):
    x = x.astype(jnp.float32)
    s = jnp.clip(jnp.exp(x @ ws + bs), 0.0, CLIP_SCALING)
    r = x @ wr + br
    r = r / jnp.maximum(jnp.sqrt(jnp.sum(r * r, -1, keepdims=True)), NORM_EPS)
    return {"scaling": s, "rotation": r}


if __name__ == "__main__":
    key = jax.random.PRNGKey(0)
    kx, kp = jax.random.split(key)

    # Small demo shapes; N is deliberately NOT a tile multiple (ragged block).
    N, H = 200, 64
    x = jax.random.normal(kx, (N, H), jnp.float32)
    ws, bs, wr, br = init_params(kp, H)

    ref = reference_forward(x, ws, bs, wr, br)

    # f32 path: must match the reference tightly.
    w_f32, b_f32 = make_fused_params(ws, bs, wr, br, dtype=jnp.float32)
    out = gslayer_forward(x, w_f32, b_f32)
    out = jax.tree_util.tree_map(jax.block_until_ready, out)
    assert out["scaling"].shape == (N, 3) and out["scaling"].dtype == jnp.float32
    assert out["rotation"].shape == (N, 4) and out["rotation"].dtype == jnp.float32
    assert jnp.allclose(out["scaling"], ref["scaling"], atol=1e-5, rtol=1e-5)
    assert jnp.allclose(out["rotation"], ref["rotation"], atol=1e-5, rtol=1e-5)

    # bf16-activation path (simulating an upstream producer that already emits
    # bf16 — worthwhile on v5e/v6e/v7x alike; f32 acc + f32 epilogue inside).
    w_bf, b_bf = make_fused_params(ws, bs, wr, br, dtype=jnp.bfloat16)
    out_bf = gslayer_forward(x.astype(jnp.bfloat16), w_bf, b_bf)
    out_bf = jax.tree_util.tree_map(jax.block_until_ready, out_bf)
    assert jnp.allclose(out_bf["scaling"], ref["scaling"], atol=5e-2, rtol=5e-2)
    assert jnp.allclose(out_bf["rotation"], ref["rotation"], atol=5e-2, rtol=5e-2)

    print("KERNEL_OK")
</pallas_src>

<mosaic_0001>
module attributes {stable_mosaic.version = 11 : i64} {
  func.func @gslayer_kernel(%arg0: i32, %arg1: memref<112x64xf32, #tpu.memory_space<vmem>>, %arg2: memref<64x8xf32, #tpu.memory_space<vmem>>, %arg3: memref<1x8xf32, #tpu.memory_space<vmem>>, %arg4: memref<112x8xf32, #tpu.memory_space<vmem>>) attributes {dimension_semantics = [#tpu.dimension_semantics<parallel>], iteration_bounds = array<i64: 2>, scalar_prefetch = 0 : i64, scratch_operands = 0 : i64, tpu.core_type = #tpu.core_type<tc>, window_params = [{transform_indices = @transform_0, window_bounds = array<i64: 112, 64>}, {pipeline_mode = #tpu.pipeline_mode<synchronous>, transform_indices = @transform_1, window_bounds = array<i64: 64, 8>}, {pipeline_mode = #tpu.pipeline_mode<synchronous>, transform_indices = @transform_2, window_bounds = array<i64: 1, 8>}, {transform_indices = @transform_3, window_bounds = array<i64: 112, 8>}]} {
    %c0 = arith.constant 0 : index
    %c0_0 = arith.constant 0 : index
    %0 = vector.load %arg1[%c0, %c0_0] : memref<112x64xf32, #tpu.memory_space<vmem>>, vector<112x64xf32>
    %c0_1 = arith.constant 0 : index
    %c0_2 = arith.constant 0 : index
    %1 = vector.load %arg2[%c0_1, %c0_2] : memref<64x8xf32, #tpu.memory_space<vmem>>, vector<64x8xf32>
    %cst = arith.constant dense<0.000000e+00> : vector<112x8xf32>
    %2 = tpu.matmul %0, %1, %cst {dimension_numbers = #tpu.dot_dimension_numbers<[1], [0], [0], [1], [0, 0, 1, 1], [], []>} : vector<112x64xf32>, vector<64x8xf32>, vector<112x8xf32> -> vector<112x8xf32>
    %c0_3 = arith.constant 0 : index
    %c0_4 = arith.constant 0 : index
    %3 = vector.load %arg3[%c0_3, %c0_4] : memref<1x8xf32, #tpu.memory_space<vmem>>, vector<1x8xf32>
    %4 = vector.broadcast %3 : vector<1x8xf32> to vector<112x8xf32>
    %5 = arith.addf %2, %4 : vector<112x8xf32>
    %6 = tpu.iota {dimensions = array<i32: 1>} : vector<112x8xi32>
    %c3_i32 = arith.constant 3 : i32
    %7 = vector.broadcast %c3_i32 : i32 to vector<112x8xi32>
    %8 = arith.cmpi slt, %6, %7 : vector<112x8xi32>
    %c3_i32_5 = arith.constant 3 : i32
    %9 = vector.broadcast %c3_i32_5 : i32 to vector<112x8xi32>
    %10 = arith.cmpi sge, %6, %9 : vector<112x8xi32>
    %c7_i32 = arith.constant 7 : i32
    %11 = vector.broadcast %c7_i32 : i32 to vector<112x8xi32>
    %12 = arith.cmpi slt, %6, %11 : vector<112x8xi32>
    %13 = arith.andi %10, %12 : vector<112x8xi1>
    %14 = math.exp %5 : vector<112x8xf32>
    %cst_6 = arith.constant 0.000000e+00 : f32
    %cst_7 = arith.constant 2.000000e-01 : f32
    %15 = vector.broadcast %cst_6 : f32 to vector<112x8xf32>
    %16 = arith.maximumf %15, %14 : vector<112x8xf32>
    %17 = vector.broadcast %cst_7 : f32 to vector<112x8xf32>
    %18 = arith.minimumf %17, %16 : vector<112x8xf32>
    %19 = arith.mulf %5, %5 : vector<112x8xf32>
    %cst_8 = arith.constant 0.000000e+00 : f32
    %20 = vector.broadcast %cst_8 : f32 to vector<112x8xf32>
    %21 = arith.select %13, %19, %20 : vector<112x8xi1>, vector<112x8xf32>
    %cst_9 = arith.constant dense<0.000000e+00> : vector<112xf32>
    %22 = vector.multi_reduction <add>, %21, %cst_9 [1] : vector<112x8xf32> to vector<112xf32>
    %23 = vector.shape_cast %22 : vector<112xf32> to vector<112x1xf32>
    %cst_10 = arith.constant 1.000000e-24 : f32
    %24 = vector.broadcast %cst_10 : f32 to vector<112x1xf32>
    %25 = arith.maximumf %23, %24 : vector<112x1xf32>
    %26 = math.rsqrt %25 : vector<112x1xf32>
    %27 = vector.broadcast %26 : vector<112x1xf32> to vector<112x8xf32>
    %28 = arith.mulf %5, %27 : vector<112x8xf32>
    %cst_11 = arith.constant 0.000000e+00 : f32
    %29 = vector.broadcast %cst_11 : f32 to vector<112x8xf32>
    %30 = arith.select %13, %28, %29 : vector<112x8xi1>, vector<112x8xf32>
    %31 = arith.select %8, %18, %30 : vector<112x8xi1>, vector<112x8xf32>
    %c0_12 = arith.constant 0 : index
    %c0_13 = arith.constant 0 : index
    %32 = vector.load %arg4[%c0_12, %c0_13] : memref<112x8xf32, #tpu.memory_space<vmem>>, vector<112x8xf32>
    tpu.vector_store %arg4[%c0_12, %c0_13], %31 {strides = array<i32>} : memref<112x8xf32, #tpu.memory_space<vmem>>, vector<112x8xf32>,
    return
  }
  func.func @transform_0(%arg0: i32) -> (i32, i32) {
    %c0_i32 = arith.constant 0 : i32
    %c0_i32_0 = arith.constant 0 : i32
    return %arg0, %c0_i32 : i32, i32
  }
  func.func @transform_1(%arg0: i32) -> (i32, i32) {
    %c0_i32 = arith.constant 0 : i32
    %c0_i32_0 = arith.constant 0 : i32
    %c0_i32_1 = arith.constant 0 : i32
    return %c0_i32, %c0_i32_0 : i32, i32
  }
  func.func @transform_2(%arg0: i32) -> (i32, i32) {
    %c0_i32 = arith.constant 0 : i32
    %c0_i32_0 = arith.constant 0 : i32
    %c0_i32_1 = arith.constant 0 : i32
    return %c0_i32, %c0_i32_0 : i32, i32
  }
  func.func @transform_3(%arg0: i32) -> (i32, i32) {
    %c0_i32 = arith.constant 0 : i32
    %c0_i32_0 = arith.constant 0 : i32
    return %arg0, %c0_i32 : i32, i32
  }
}

</mosaic_0001>

<bundles_post_ra>
// kernel: tpu_custom_call.1
= control target key start
LH: loop header
LB: loop body
LE: loop exit
PB: predicated region body
PF: predicated region fallthrough
CT: control target
= control target key end

     0   :  { %s1252_s12 = smov 0   ;;  %s1254_s13 = smov 0   ;;  %s1684_s0 = inlined_call_operand.vmem [shape: f32[200,64], index: 0, kind: input, shape index: {}]   ;;  %s1685_s1 = inlined_call_operand.vmem [shape: f32[64,8], index: 1, kind: input, shape index: {}]   ;;  %s1686_s2 = inlined_call_operand.vmem [shape: f32[1,8], index: 2, kind: input, shape index: {}]   ;;  %s1687_s3 = inlined_call_operand.vmem [shape: f32[200,8], index: 3, kind: output, shape index: {}]  }
   0x1   :  { %s1256_s14 = smov 0  }
   0x2 LB: > { %s1265_s15 = sadd.s32 4294967295, %s1198_s14   ;;  %s1267_s16 = sadd.s32 1, %s1198_s14   ;;  %s1198_s14 = sphi %s1256_s14, %s1696_s14   ;;  %s1194_s13 = sphi %s1254_s13, %s1695_s13   ;;  %s1190_s12 = sphi %s1252_s12, %s1694_s12  }
   0x3   : > { %s85_s17 = ssub.s32 %s1198_s14, %s1267_s16  ;;  %s88_s18 = sadd.s32 1, %s1194_s13 }
   0x4   : > { %p86_p0 = scmp.eq.s32.totalorder %s85_s17, 0  ;;  %p98_p1 = scmp.ne.s32.totalorder %s1194_s13, %s1190_s12 }
   0x5   : > { %p99_p2 = scmp.eq.s32.totalorder %s1265_s15, 1  ;;  %p889_p3 = scmp.ge.s32.totalorder %s1198_s14, 1 }
   0x6   : > { %s1275_s19 = scalar_select %p86_p0, %s1194_s13, %s88_s18  }
   0x7   : > { %p1277_p4 = por %p99_p2, %p98_p1  ;;  %p146_p5 = scmp.lt.s32.totalorder %s1198_s14, 3 }
   0x9   : > { %p147_p6 = pnand %p889_p3, %p146_p5 }
   0xa   : > { %s1288_s25 = smul.u32 (!%p147_p6), 14, %s1265_s15  ;;  %s170_s24 = sand.u32 (!%p147_p6), 1, %s1190_s12  }
   0xb   : > { %150 = sbr.rel (%p147_p6) target bundleno = 470 (0x1d6), region = 32 }
   0xc   : > { %p178_p7 = scmp.lt.s32.totalorder (!%p147_p6), %s1288_s25, 24  ;;  %s1481_s26 = smul.u32 (!%p147_p6), 112, %s170_s24 }
   0xe   : > { %s1499_s12 = scalar_lea.vmem (!%p147_p6), [#allocation2], %s1481_s26  }
  0x10   : > { %v213_v0 = vld [vmem:[%s1685_s1 + $0x38] sm:$0xff]  ;;  %v212_v1 = vld [vmem:[%s1685_s1 + $0x30] sm:$0xff]  ;;  %v211_v2 = vld [vmem:[%s1685_s1 + $0x28] sm:$0xff]  ;;  %s179_s30 = scalar_select %p178_p7, %s1288_s25, 24  ;;  %vm221_vm0 = vcmask 523264   ;;  %v399_v22 = vlaneseq  ;;  %vm489_vm4 = vcmask 64512  }
  0x11   : > { %941 = vmatprep.subr.mxu0 %v213_v0  ;;  %978 = vmatprep.subr.mxu1 %v213_v0  ;;  %v210_v3 = vld [vmem:[%s1685_s1 + $0x20] sm:$0xff]  ;;  %v209_v4 = vld [vmem:[%s1685_s1 + $0x18] sm:$0xff]  ;;  %v208_v5 = vld [vmem:[%s1685_s1 + $0x10] sm:$0xff]  ;;  %s624_s27 = ssub.s32 (%p1277_p4), 25, %s1288_s25  ;;  %s918_s28 = smul.u32 (%p1277_p4), 112, %s1265_s15 }
  0x12   : > { %942 = vmatpush3.msra.mxu0 %v213_v0  ;;  %986 = vmatpush3.msra.mxu1 %v213_v0  ;;  %s890_s8 = sshll.u32 %s179_s30, 3  ;;  %v207_v6 = vld [vmem:[%s1685_s1 + $0x8] sm:$0xff]  ;;  %v206_v7 = vld [vmem:[%s1685_s1] sm:$0xff]  ;;  %v1343_v23 = vand.u32 127, %v399_v22  ;;  %p625_p8 = scmp.lt.s32.totalorder (%p1277_p4), %s624_s27, 14 }
  0x13   : > { %943 = vmatprep.subr.mxu0 %v212_v1  ;;  %979 = vmatprep.subr.mxu1 %v212_v1  ;;  %s1310_s17 = scalar_lea.vmem %s1684_s0, %s890_s8  ;;  %v1348_v24 = vld [vmem:[%s1686_s2] ss:$0 sm:$0xff]  ;;  %s1600_s4 = scalar_lea.vmem (%p1277_p4), %s1687_s3, %s918_s28  }
  0x14   : > { %944 = vmatpush3.msra.mxu0 %v212_v1  ;;  %987 = vmatpush3.msra.mxu1 %v212_v1  ;;  %v192_v8 = vld [vmem:[%s1310_s17] sm:$0xff]  ;;  %v193_v10 = vld [vmem:[%s1310_s17 + $0x8] sm:$0xff]  ;;  %v194_v12 = vld [vmem:[%s1310_s17 + $0x10] sm:$0xff]  ;;  %vm402_vm1 = vcmp.ge.s32.totalorder %v1343_v23, 3  ;;  %vm403_vm2 = vcmp.lt.s32.totalorder %v1343_v23, 7  ;;  %vm401_vm5 = vcmp.lt.s32.totalorder %v1343_v23, 3 }
  0x15   : > { %945 = vmatprep.subr.mxu0 %v211_v2  ;;  %980 = vmatprep.subr.mxu1 %v211_v2  ;;  %v200_v9 = vld [vmem:[%s1310_s17 + $0x40] sm:$0xff]  ;;  %v201_v11 = vld [vmem:[%s1310_s17 + $0x48] sm:$0xff]  ;;  %v202_v13 = vld [vmem:[%s1310_s17 + $0x50] sm:$0xff] }
  0x16   : > { %946 = vmatpush3.msra.mxu0 %v211_v2  ;;  %988 = vmatpush3.msra.mxu1 %v211_v2  ;;  %v195_v14 = vld [vmem:[%s1310_s17 + $0x18] sm:$0xff]  ;;  %v196_v16 = vld [vmem:[%s1310_s17 + $0x20] sm:$0xff]  ;;  %v197_v18 = vld [vmem:[%s1310_s17 + $0x28] sm:$0xff] }
  0x17   : > { %947 = vmatprep.subr.mxu0 %v210_v3  ;;  %981 = vmatprep.subr.mxu1 %v210_v3  ;;  %v203_v15 = vld [vmem:[%s1310_s17 + $0x58] sm:$0xff]  ;;  %v204_v17 = vld [vmem:[%s1310_s17 + $0x60] sm:$0xff]  ;;  %v205_v19 = vld [vmem:[%s1310_s17 + $0x68] sm:$0xff] }
  0x18   : > { %948 = vmatpush3.msra.mxu0 %v210_v3  ;;  %989 = vmatpush3.msra.mxu1 %v210_v3  ;;  %v198_v20 = vld [vmem:[%s1310_s17 + $0x30] sm:$0xff]  ;;  %v199_v21 = vld [vmem:[%s1310_s17 + $0x38] sm:$0xff]  ;;  %vm1358_vm3 = vmand %vm402_vm1, %vm403_vm2 }
  0x19   : > { %949 = vmatprep.subr.mxu0 %v209_v4  ;;  %982 = vmatprep.subr.mxu1 %v209_v4 }
  0x1a   : > { %950 = vmatpush3.msra.mxu0 %v209_v4  ;;  %990 = vmatpush3.msra.mxu1 %v209_v4 }
  0x1b   : > { %951 = vmatprep.subr.mxu0 %v208_v5  ;;  %983 = vmatprep.subr.mxu1 %v208_v5 }
  0x1c   : > { %952 = vmatpush3.msra.mxu0 %v208_v5  ;;  %991 = vmatpush3.msra.mxu1 %v208_v5 }
  0x1d   : > { %953 = vmatprep.subr.mxu0 %v207_v6  ;;  %984 = vmatprep.subr.mxu1 %v207_v6 }
  0x1e   : > { %954 = vmatpush3.msra.mxu0 %v207_v6  ;;  %992 = vmatpush3.msra.mxu1 %v207_v6 }
  0x1f   : > { %955 = vmatprep.subr.mxu0 %v206_v7  ;;  %985 = vmatprep.subr.mxu1 %v206_v7 }
  0x20   : > { %956 = vmatpush3.msra.mxu0 %v206_v7  ;;  %993 = vmatpush3.msra.mxu1 %v206_v7 }
  0x21   : > { %957 = vmatprep.mubr.msk.f32.mxu0 %vm221_vm0, %v192_v8  ;;  %969 = vmatprep.mubr.msk.f32.mxu1 %vm221_vm0, %v200_v9 }
  0x22   : > { %958 = vmatmul.mubr.msk.f32.vlgmr.msra.gmra.mxu0 %vm221_vm0, %v193_v10  ;;  %970 = vmatmul.mubr.msk.f32.vlgmr.msra.gmra.mxu1 %vm221_vm0, %v201_v11 }
  0x23   : > { %960 = vmatprep.mubr.msk.f32.mxu0 %vm221_vm0, %v194_v12  ;;  %972 = vmatprep.mubr.msk.f32.mxu1 %vm221_vm0, %v202_v13 }
  0x26   : > { %961 = vmatmul.mubr.msk.f32.gmra.mxu0 %vm221_vm0, %v195_v14  ;;  %973 = vmatmul.mubr.msk.f32.gmra.mxu1 %vm221_vm0, %v203_v15 }
  0x27   : > { %963 = vmatprep.mubr.msk.f32.mxu0 %vm221_vm0, %v196_v16  ;;  %975 = vmatprep.mubr.msk.f32.mxu1 %vm221_vm0, %v204_v17 }
  0x2a   : > { %964 = vmatmul.mubr.msk.f32.gmra.mxu0 %vm221_vm0, %v197_v18  ;;  %976 = vmatmul.mubr.msk.f32.gmra.mxu1 %vm221_vm0, %v205_v19 }
  0x2b   : > { %966 = vmatprep.mubr.msk.f32.mxu0 %vm221_vm0, %v198_v20 }
  0x2e   : > { %967 = vmatmul.mubr.msk.f32.gmra.mxu0 %vm221_vm0, %v199_v21 }
  0xe2   : > { %v959_v25 = vpop.f32.mrf.mxu0  ;;  %v971_v26 = vpop.f32.mrf.mxu1 }
  0xe3   : > { %v1353_v27 = vadd.f32 %v959_v25, %v1348_v24  ;;  %v1356_v28 = vadd.f32 %v971_v26, %v1348_v24 }
  0xe4   : > { %v330_v29 = vpop.f32.mrf.mxu0  ;;  %v370_v30 = vpop.f32.mrf.mxu1 }
  0xe5   : > { %v470_v34 = vmul.f32 %v1356_v28, %v1356_v28  ;;  %v462_v35 = vmul.f32 %v1353_v27, %v1353_v27  ;;  %v1367_v36 = vadd.f32 %v1348_v24, %v330_v29  ;;  %v1382_v46 = vadd.f32 %v1348_v24, %v370_v30 }
  0xe6   : > { %v962_v32 = vpop.f32.mrf.mxu0  ;;  %v974_v33 = vpop.f32.mrf.mxu1 }
  0xe7   : > { %v1370_v37 = vadd.f32 %v962_v32, %v1348_v24  ;;  %v1373_v39 = vadd.f32 %v974_v33, %v1348_v24  ;;  %v484_v40 = vsel %vm1358_vm3, %v470_v34, 0.0  ;;  %v476_v41 = vsel %vm1358_vm3, %v462_v35, 0.0 }
  0xe8   : > { %v340_v38 = vpop.f32.mrf.mxu0  ;;  %v517_v42 = vsel %vm489_vm4, %v484_v40, 0.0  ;;  %v380_v43 = vpop.f32.mrf.mxu1  ;;  %v493_v44 = vsel %vm489_vm4, %v476_v41, 0.0  ;;  %v461_v48 = vmul.f32 %v1367_v36, %v1367_v36  ;;  %v469_v60 = vmul.f32 %v1382_v46, %v1382_v46 }
  0xe9   : > { %518 = vadd.xlane.f32.xlu1 %v517_v42  ;;  %494 = vadd.xlane.f32.xlu0 %v493_v44  ;;  %v464_v47 = vmul.f32 %v1370_v37, %v1370_v37  ;;  %v1389_v49 = vadd.f32 %v1348_v24, %v340_v38  ;;  %v1392_v50 = vadd.f32 %v1348_v24, %v380_v43  ;;  %v423_v38 = vmul.f32 1.442695, %v1356_v28 }
  0xea   : > { %v965_v45 = vpop.f32.mrf.mxu0  ;;  %v472_v52 = vmul.f32 %v1373_v39, %v1373_v39  ;;  %v475_v54 = vsel %vm1358_vm3, %v461_v48, 0.0  ;;  %v977_v61 = vpop.f32.mrf.mxu1  ;;  %v483_v3 = vsel %vm1358_vm3, %v469_v60, 0.0  ;;  %v407_v40 = vmul.f32 1.442695, %v1353_v27 }
  0xeb   : > { %v478_v53 = vsel %vm1358_vm3, %v464_v47, 0.0  ;;  %v490_v56 = vsel %vm489_vm4, %v475_v54, 0.0  ;;  %v1403_v58 = vadd.f32 %v965_v45, %v1348_v24  ;;  %v463_v1 = vmul.f32 %v1389_v49, %v1389_v49 }
  0xec   : > { %v350_v51 = vpop.f32.mrf.mxu0  ;;  %v499_v55 = vsel %vm489_vm4, %v478_v53, 0.0  ;;  %v486_v59 = vsel %vm1358_vm3, %v472_v52, 0.0  ;;  %v471_v2 = vmul.f32 %v1392_v50, %v1392_v50  ;;  %v514_v4 = vsel %vm489_vm4, %v483_v3, 0.0  ;;  %v390_v9 = vpop.f32.mrf.mxu1 }
  0xed   : > { %500 = vadd.xlane.f32.xlu1 %v499_v55  ;;  %491 = vadd.xlane.f32.xlu0 %v490_v56  ;;  %v1410_v62 = vadd.f32 %v1348_v24, %v350_v51  ;;  %v523_v63 = vsel %vm489_vm4, %v486_v59, 0.0  ;;  %v477_v7 = vsel %vm1358_vm3, %v463_v1, 0.0  ;;  %v466_v10 = vmul.f32 %v1403_v58, %v1403_v58 }
  0xee   : > { %v968_v57 = vpop.f32.mrf.mxu0  ;;  %v485_v8 = vsel %vm1358_vm3, %v471_v2, 0.0  ;;  %v496_v12 = vsel %vm489_vm4, %v477_v7, 0.0  ;;  %v1437_v14 = vadd.f32 %v977_v61, %v1348_v24  ;;  %v1440_v15 = vadd.f32 %v1348_v24, %v390_v9 }
  0xef   : > { %v1421_v5 = vadd.f32 %v968_v57, %v1348_v24  ;;  %v465_v11 = vmul.f32 %v1410_v62, %v1410_v62  ;;  %v520_v13 = vsel %vm489_vm4, %v485_v8, 0.0  ;;  %v480_v16 = vsel %vm1358_vm3, %v466_v10, 0.0 }
  0xf0   : > { %v360_v0 = vpop.f32.mrf.mxu0  ;;  %v505_v20 = vsel %vm489_vm4, %v480_v16, 0.0  ;;  %v474_v25 = vmul.f32 %v1437_v14, %v1437_v14  ;;  %v473_v26 = vmul.f32 %v1440_v15, %v1440_v15  ;;  %v405_v41 = vmul.f32 1.442695, %v1367_v36 }
  0xf1   : > { %524 = vadd.xlane.f32.xlu1 %v523_v63  ;;  %515 = vadd.xlane.f32.xlu0 %v514_v4  ;;  %v1424_v6 = vadd.f32 %v1348_v24, %v360_v0  ;;  %v479_v17 = vsel %vm1358_vm3, %v465_v11, 0.0  ;;  %v468_v18 = vmul.f32 %v1421_v5, %v1421_v5  ;;  %v421_v42 = vmul.f32 1.442695, %v1382_v46 }
  0xf2   : > { %v502_v21 = vsel %vm489_vm4, %v479_v17, 0.0  ;;  %v488_v32 = vsel %vm1358_vm3, %v474_v25, 0.0  ;;  %v487_v33 = vsel %vm1358_vm3, %v473_v26, 0.0  ;;  %1084 = vpow2.f32 %v423_v38 }
  0xf3   : > { %v467_v19 = vmul.f32 %v1424_v6, %v1424_v6  ;;  %v482_v22 = vsel %vm1358_vm3, %v468_v18, 0.0  ;;  %v529_v34 = vsel %vm489_vm4, %v488_v32, 0.0  ;;  %v526_v35 = vsel %vm489_vm4, %v487_v33, 0.0 }
  0xf4   : > { %v511_v29 = vsel %vm489_vm4, %v482_v22, 0.0  ;;  %v411_v43 = vmul.f32 1.442695, %v1370_v37  ;;  %1086 = vpow2.f32 %v407_v40  ;;  %v427_v45 = vmul.f32 1.442695, %v1373_v39 }
  0xf5   : > { %497 = vadd.xlane.f32.xlu1 %v496_v12  ;;  %521 = vadd.xlane.f32.xlu0 %v520_v13  ;;  %v481_v24 = vsel %vm1358_vm3, %v467_v19, 0.0  ;;  %1088 = vpow2.f32 %v405_v41  ;;  %v409_v51 = vmul.f32 1.442695, %v1389_v49  ;;  %v425_v53 = vmul.f32 1.442695, %v1392_v50 }
  0xf6   : > { %v508_v30 = vsel %vm489_vm4, %v481_v24, 0.0  ;;  %1090 = vpow2.f32 %v421_v42  ;;  %v415_v56 = vmul.f32 1.442695, %v1403_v58  ;;  %v413_v60 = vmul.f32 1.442695, %v1410_v62 }
  0xf7   : > { %1092 = vpow2.f32 %v411_v43  ;;  %v419_v61 = vmul.f32 1.442695, %v1421_v5  ;;  %v417_v4 = vmul.f32 1.442695, %v1424_v6  ;;  %v429_v40 = vmul.f32 1.442695, %v1440_v15 }
  0xf9   : > { %506 = vadd.xlane.f32.xlu1 %v505_v20  ;;  %503 = vadd.xlane.f32.xlu0 %v502_v21  ;;  %v431_v21 = vmul.f32 1.442695, %v1437_v14 }
  0xfd   : > { %512 = vadd.xlane.f32.xlu1 %v511_v29  ;;  %509 = vadd.xlane.f32.xlu0 %v508_v30 }
  0xff   : > { %v1085_v3 = vpop.eup %1084 }
 0x100   : > { %v442_v12 = vmax.f32 %v1085_v3, 0.0 }
 0x101   : > { %530 = vadd.xlane.f32.xlu1 %v529_v34  ;;  %527 = vadd.xlane.f32.xlu0 %v526_v35  ;;  %v1087_v7 = vpop.eup %1086 }
 0x102   : > { %v1089_v8 = vpop.eup %1088  ;;  %v434_v18 = vmax.f32 %v1087_v7, 0.0  ;;  %v456_v29 = vmin.f32 %v442_v12, 0.2 }
 0x103   : > { %v1483_v11 = vpop.eup %1090  ;;  %v433_v42 = vmax.f32 %v1089_v8, 0.0 }
 0x104   : > { %v1093_v17 = vpop.eup %1092  ;;  %v448_v35 = vmin.f32 %v434_v18, 0.2 }
 0x105   : > { %v436_v38 = vmax.f32 %v1093_v17, 0.0 }
 0x172   : > { %v519_v44 = vpop.xlane.xlu1 %518  ;;  %v495_v48 = vpop.xlane.xlu0 %494 }
 0x173   : > { %v541_v47 = vmax.f32 %v519_v44, 1e-24  ;;  %v533_v52 = vmax.f32 %v495_v48, 1e-24 }
 0x175   : > { %1094 = vrsqrt.f32 %v541_v47 }
 0x176   : > { %1096 = vrsqrt.f32 %v533_v52  ;;  %v501_v54 = vpop.xlane.xlu1 %500  ;;  %v492_v55 = vpop.xlane.xlu0 %491 }
 0x177   : > { %1098 = vpow2.f32 %v427_v45  ;;  %v535_v57 = vmax.f32 %v501_v54, 1e-24  ;;  %v532_v59 = vmax.f32 %v492_v55, 1e-24 }
 0x178   : > { %1100 = vpow2.f32 %v409_v51 }
 0x179   : > { %1102 = vpow2.f32 %v425_v53 }
 0x17a   : > { %1104 = vrsqrt.f32 %v535_v57  ;;  %v525_v63 = vpop.xlane.xlu1 %524  ;;  %v516_v0 = vpop.xlane.xlu0 %515 }
 0x17b   : > { %1106 = vrsqrt.f32 %v532_v59  ;;  %v543_v1 = vmax.f32 %v525_v63, 1e-24  ;;  %v540_v2 = vmax.f32 %v516_v0, 1e-24  ;;  %v441_v63 = vmax.f32 %v1483_v11, 0.0 }
 0x17c   : > { %1108 = vpow2.f32 %v415_v56  ;;  %v450_v56 = vmin.f32 %v436_v38, 0.2 }
 0x17d   : > { %1110 = vpow2.f32 %v413_v60  ;;  %v455_v18 = vmin.f32 %v441_v63, 0.2 }
 0x17e   : > { %1112 = vrsqrt.f32 %v543_v1  ;;  %v498_v9 = vpop.xlane.xlu1 %497  ;;  %v522_v10 = vpop.xlane.xlu0 %521 }
 0x17f   : > { %1114 = vrsqrt.f32 %v540_v2  ;;  %v534_v13 = vmax.f32 %v498_v9, 1e-24  ;;  %v542_v16 = vmax.f32 %v522_v10, 1e-24 }
 0x180   : > { %1116 = vpow2.f32 %v419_v61  ;;  %v447_v61 = vmin.f32 %v433_v42, 0.2 }
 0x181   : > { %1118 = vpow2.f32 %v417_v4 }
 0x182   : > { %v1095_v19 = vpop.eup %1094  ;;  %1120 = vrsqrt.f32 %v534_v13  ;;  %v507_v24 = vpop.xlane.xlu1 %506 }
 0x183   : > { %v1097_v20 = vpop.eup %1096  ;;  %v569_v22 = vmul.f32 %v1095_v19, %v1356_v28  ;;  %1122 = vrsqrt.f32 %v542_v16  ;;  %v504_v25 = vpop.xlane.xlu0 %503  ;;  %v537_v32 = vmax.f32 %v507_v24, 1e-24 }
 0x184   : > { %v1099_v26 = vpop.eup %1098  ;;  %v561_v30 = vmul.f32 %v1097_v20, %v1353_v27  ;;  %v536_v33 = vmax.f32 %v504_v25, 1e-24 }
 0x185   : > { %v1489_v34 = vpop.eup %1100  ;;  %v583_v41 = vsel %vm1358_vm3, %v569_v22, 0.0  ;;  %1124 = vrsqrt.f32 %v537_v32  ;;  %v444_v57 = vmax.f32 %v1099_v26, 0.0 }
 0x186   : > { %v1103_v28 = vpop.eup %1102  ;;  %v597_v43 = vsel %vm401_vm5, %v456_v29, %v583_v41  ;;  %v575_v44 = vsel %vm1358_vm3, %v561_v30, 0.0  ;;  %1126 = vrsqrt.f32 %v536_v33  ;;  %v513_v47 = vpop.xlane.xlu1 %512  ;;  %v435_v12 = vmax.f32 %v1489_v34, 0.0 }
 0x187   : > { %v1105_v27 = vpop.eup %1104  ;;  %611 = vst.msk [vmem:[%s1499_s12 + $0x48] sm:$0xff] %vm489_vm4, %v597_v43  ;;  %v589_v45 = vsel %vm401_vm5, %v448_v35, %v575_v44  ;;  %v510_v48 = vpop.xlane.xlu0 %509  ;;  %1128 = vpow2.f32 %v431_v21  ;;  %v539_v53 = vmax.f32 %v513_v47, 1e-24  ;;  %v458_v13 = vmin.f32 %v444_v57, 0.2 }
 0x188   : > { %v1107_v51 = vpop.eup %1106  ;;  %603 = vst.msk [vmem:[%s1499_s12 + $0x8] sm:$0xff] %vm489_vm4, %v589_v45  ;;  %v563_v52 = vmul.f32 %v1105_v27, %v1370_v37  ;;  %v538_v54 = vmax.f32 %v510_v48, 1e-24  ;;  %1130 = vpow2.f32 %v429_v40  ;;  %v443_v19 = vmax.f32 %v1103_v28, 0.0 }
 0x189   : > { %v1109_v55 = vpop.eup %1108  ;;  %v560_v59 = vmul.f32 %v1107_v51, %v1367_v36  ;;  %1132 = vrsqrt.f32 %v539_v53  ;;  %v449_v26 = vmin.f32 %v435_v12, 0.2 }
 0x18a   : > { %v1111_v60 = vpop.eup %1110  ;;  %v577_v0 = vsel %vm1358_vm3, %v563_v52, 0.0  ;;  %1134 = vrsqrt.f32 %v538_v54  ;;  %v531_v3 = vpop.xlane.xlu1 %530  ;;  %v438_v29 = vmax.f32 %v1109_v55, 0.0  ;;  %v457_v32 = vmin.f32 %v443_v19, 0.2 }
 0x18b   : > { %v1113_v1 = vpop.eup %1112  ;;  %v591_v37 = vsel %vm401_vm5, %v450_v56, %v577_v0  ;;  %v574_v2 = vsel %vm1358_vm3, %v560_v59, 0.0  ;;  %v528_v4 = vpop.xlane.xlu0 %527  ;;  %v545_v9 = vmax.f32 %v531_v3, 1e-24  ;;  %v437_v33 = vmax.f32 %v1111_v60, 0.0 }
 0x18c   : > { %v1115_v36 = vpop.eup %1114  ;;  %605 = vst.msk [vmem:[%s1499_s12 + $0x18] sm:$0xff] %vm489_vm4, %v591_v37  ;;  %v588_v7 = vsel %vm401_vm5, %v447_v61, %v574_v2  ;;  %v571_v8 = vmul.f32 %v1113_v1, %v1373_v39  ;;  %v544_v10 = vmax.f32 %v528_v4, 1e-24  ;;  %v452_v42 = vmin.f32 %v438_v29, 0.2 }
 0x18d   : > { %v1117_v11 = vpop.eup %1116  ;;  %602 = vst.msk [vmem:[%s1499_s12] sm:$0xff] %vm489_vm4, %v588_v7  ;;  %v568_v16 = vmul.f32 %v1115_v36, %v1382_v46  ;;  %1136 = vrsqrt.f32 %v545_v9  ;;  %v451_v45 = vmin.f32 %v437_v33, 0.2 }
 0x18e   : > { %v1119_v17 = vpop.eup %1118  ;;  %v585_v20 = vsel %vm1358_vm3, %v571_v8, 0.0  ;;  %1138 = vrsqrt.f32 %v544_v10  ;;  %v440_v43 = vmax.f32 %v1117_v11, 0.0 }
 0x18f   : > { %v1121_v39 = vpop.eup %1120  ;;  %v599_v21 = vsel %vm401_vm5, %v458_v13, %v585_v20  ;;  %v582_v22 = vsel %vm1358_vm3, %v568_v16, 0.0  ;;  %v439_v47 = vmax.f32 %v1119_v17, 0.0 }
 0x190   : > { %v1123_v24 = vpop.eup %1122  ;;  %613 = vst.msk [vmem:[%s1499_s12 + $0x58] sm:$0xff] %vm489_vm4, %v599_v21  ;;  %v596_v46 = vsel %vm401_vm5, %v455_v18, %v582_v22  ;;  %v562_v25 = vmul.f32 %v1121_v39, %v1389_v49  ;;  %v454_v55 = vmin.f32 %v440_v43, 0.2 }
 0x191   : > { %610 = vst.msk [vmem:[%s1499_s12 + $0x40] sm:$0xff] %vm489_vm4, %v596_v46  ;;  %v570_v30 = vmul.f32 %v1123_v24, %v1392_v50  ;;  %v453_v59 = vmin.f32 %v439_v47, 0.2 }
 0x192   : > { %v576_v34 = vsel %vm1358_vm3, %v562_v25, 0.0  ;;  %v1125_v35 = vpop.eup %1124 }
 0x193   : > { %v590_v38 = vsel %vm401_vm5, %v449_v26, %v576_v34  ;;  %v584_v40 = vsel %vm1358_vm3, %v570_v30, 0.0  ;;  %v1127_v49 = vpop.eup %1126  ;;  %v565_v50 = vmul.f32 %v1125_v35, %v1403_v58 }
 0x194   : > { %604 = vst.msk [vmem:[%s1499_s12 + $0x10] sm:$0xff] %vm489_vm4, %v590_v38  ;;  %v598_v41 = vsel %vm401_vm5, %v457_v32, %v584_v40  ;;  %v1129_v28 = vpop.eup %1128  ;;  %v564_v44 = vmul.f32 %v1127_v49, %v1410_v62 }
 0x195   : > { %612 = vst.msk [vmem:[%s1499_s12 + $0x50] sm:$0xff] %vm489_vm4, %v598_v41  ;;  %v1131_v27 = vpop.eup %1130  ;;  %v579_v48 = vsel %vm1358_vm3, %v565_v50, 0.0  ;;  %v446_v56 = vmax.f32 %v1129_v28, 0.0 }
 0x196   : > { %v1133_v51 = vpop.eup %1132  ;;  %v593_v52 = vsel %vm401_vm5, %v452_v42, %v579_v48  ;;  %v578_v58 = vsel %vm1358_vm3, %v564_v44, 0.0  ;;  %v445_v60 = vmax.f32 %v1131_v27, 0.0 }
 0x197   : > { %v1135_v53 = vpop.eup %1134  ;;  %607 = vst.msk [vmem:[%s1499_s12 + $0x28] sm:$0xff] %vm489_vm4, %v593_v52  ;;  %v592_v62 = vsel %vm401_vm5, %v451_v45, %v578_v58  ;;  %v567_v54 = vmul.f32 %v1133_v51, %v1421_v5  ;;  %v460_v2 = vmin.f32 %v446_v56, 0.2 }
 0x198   : > { %606 = vst.msk [vmem:[%s1499_s12 + $0x20] sm:$0xff] %vm489_vm4, %v592_v62  ;;  %v566_v57 = vmul.f32 %v1135_v53, %v1424_v6  ;;  %v459_v4 = vmin.f32 %v445_v60, 0.2 }
 0x199   : > { %v581_v61 = vsel %vm1358_vm3, %v567_v54, 0.0 }
 0x19a   : > { %v1137_v63 = vpop.eup %1136  ;;  %v595_v0 = vsel %vm401_vm5, %v454_v55, %v581_v61  ;;  %v580_v5 = vsel %vm1358_vm3, %v566_v57, 0.0 }
 0x19b   : > { %v1139_v1 = vpop.eup %1138  ;;  %609 = vst.msk [vmem:[%s1499_s12 + $0x38] sm:$0xff] %vm489_vm4, %v595_v0  ;;  %v594_v6 = vsel %vm401_vm5, %v453_v59, %v580_v5  ;;  %v573_v37 = vmul.f32 %v1137_v63, %v1437_v14 }
 0x19c   : > { %608 = vst.msk [vmem:[%s1499_s12 + $0x30] sm:$0xff] %vm489_vm4, %v594_v6  ;;  %v572_v3 = vmul.f32 %v1139_v1, %v1440_v15  ;;  %622 = sbr.rel (!%p1277_p4) target bundleno = 470 (0x1d6), region = 36 }
 0x19d   : > { %v587_v36 = vsel %vm1358_vm3, %v573_v37, 0.0 }
 0x19e   : > { %v601_v7 = vsel %vm401_vm5, %v460_v2, %v587_v36  ;;  %v586_v8 = vsel %vm1358_vm3, %v572_v3, 0.0 }
 0x19f   : > { %615 = vst.msk [vmem:[%s1499_s12 + $0x68] sm:$0xff] %vm489_vm4, %v601_v7  ;;  %v600_v14 = vsel %vm401_vm5, %v459_v4, %v586_v8 }
 0x1a0   : > { %614 = vst.msk [vmem:[%s1499_s12 + $0x60] sm:$0xff] %vm489_vm4, %v600_v14 }
 0x1a1   : > { %s1698_s27 = smov (!%p625_p8, %s624_s27), 14 }
 0x1a2   : > { %s906_s5 = sshll.u32 %s1698_s27, 7 }
 0x1a3   : > { %p909_p9 = scmp.eq.s32.totalorder %s906_s5, 0 }
 0x1a4   : > { %1140 = sdivrem.u32 (!%p909_p9), %s1698_s27, 14 }
 0x1a5   : > { %633 = sbr.rel (%p909_p9) target bundleno = 470 (0x1d6), region = 40 }
 0x1ad   : > { %s1606_s20 = spop.drf %1140 }
 0x1ae   : > { %p910_p10 = scmp.le.s32.totalorder %s1606_s20, 0 }
 0x1af   : > { %s1691_s15 = smov (!%p910_p10), %s1600_s4  ;;  %s1692_s25 = smov (!%p910_p10), %s1499_s12 }
 0x1b0   : > { %842 = sbr.rel (%p910_p10) target bundleno = 445 (0x1bd), region = 116  ;;  %s1615_s6 = smov (!%p910_p10), 0  }
 0x1b1   : > { %s1617_s7 = smov (!%p910_p10), 0  }
 0x1b5 LB: >> { %v724_v23 = vld [vmem:[%s1206_s25] sm:$0xff]  ;;  %v726_v31 = vld [vmem:[%s1206_s25 + $0x8] sm:$0xff]  ;;  %v728_v15 = vld [vmem:[%s1206_s25 + $0x10] sm:$0xff]  ;;  %s752_s8 = sadd.s32 1, %s1210_s6  ;;  %s718_s7 = sadd.s32 1, %s1214_s7   ;;  %s1214_s7 = sphi %s1617_s7, %s718_s7   ;;  %s1210_s6 = sphi %s1615_s6, %s1693_s6   ;;  %s1206_s25 = sphi %s1692_s25, %s757_s25   ;;  %s1202_s15 = sphi %s1691_s15, %s758_s15  }
 0x1b6   : >> { %725 = vst [vmem:[%s1202_s15] sm:$0xff] %v724_v23  ;;  %727 = vst [vmem:[%s1202_s15 + $0x8] sm:$0xff] %v726_v31  ;;  %v730_v9 = vld [vmem:[%s1206_s25 + $0x18] sm:$0xff]  ;;  %v732_v10 = vld [vmem:[%s1206_s25 + $0x20] sm:$0xff]  ;;  %p753_p11 = scmp.ge.s32.totalorder %s752_s8, %s1606_s20  ;;  %p717_p12 = scmp.ge.s32.totalorder %s718_s7, %s1606_s20 }
 0x1b7   : >> { %729 = vst [vmem:[%s1202_s15 + $0x10] sm:$0xff] %v728_v15  ;;  %v734_v11 = vld [vmem:[%s1206_s25 + $0x28] sm:$0xff]  ;;  %731 = vst [vmem:[%s1202_s15 + $0x18] sm:$0xff] %v730_v9  ;;  %v736_v12 = vld [vmem:[%s1206_s25 + $0x30] sm:$0xff] }
 0x1b8   : >> { %733 = vst [vmem:[%s1202_s15 + $0x20] sm:$0xff] %v732_v10  ;;  %735 = vst [vmem:[%s1202_s15 + $0x28] sm:$0xff] %v734_v11  ;;  %v738_v13 = vld [vmem:[%s1206_s25 + $0x38] sm:$0xff]  ;;  %v740_v16 = vld [vmem:[%s1206_s25 + $0x40] sm:$0xff]  ;;  %s1700_s8 = smov (%p753_p11, %s752_s8), 0  ;;  %720 = sbr.rel (!%p717_p12) target bundleno = 437 (0x1b5), region = 122 }
 0x1b9   : >> { %737 = vst [vmem:[%s1202_s15 + $0x30] sm:$0xff] %v736_v12  ;;  %739 = vst [vmem:[%s1202_s15 + $0x38] sm:$0xff] %v738_v13  ;;  %v742_v17 = vld [vmem:[%s1206_s25 + $0x48] sm:$0xff]  ;;  %v744_v18 = vld [vmem:[%s1206_s25 + $0x50] sm:$0xff]  ;;  %s755_s9 = smul.u32 112, %s1700_s8  ;;  %s1693_s6 = smov %s1700_s8 }
 0x1ba   : >> { %741 = vst [vmem:[%s1202_s15 + $0x40] sm:$0xff] %v740_v16  ;;  %v746_v19 = vld [vmem:[%s1206_s25 + $0x58] sm:$0xff]  ;;  %743 = vst [vmem:[%s1202_s15 + $0x48] sm:$0xff] %v742_v17  ;;  %v748_v20 = vld [vmem:[%s1206_s25 + $0x60] sm:$0xff] }
 0x1bb   : >> { %745 = vst [vmem:[%s1202_s15 + $0x50] sm:$0xff] %v744_v18  ;;  %747 = vst [vmem:[%s1202_s15 + $0x58] sm:$0xff] %v746_v19  ;;  %v750_v39 = vld [vmem:[%s1206_s25 + $0x68] sm:$0xff]  ;;  %s757_s25 = scalar_lea.vmem %s1499_s12, %s755_s9 [#allocation2]  }
 0x1bc   : >> { %749 = vst [vmem:[%s1202_s15 + $0x60] sm:$0xff] %v748_v20  ;;  %751 = vst [vmem:[%s1202_s15 + $0x68] sm:$0xff] %v750_v39  ;;  %s758_s15 = scalar_lea.vmem %s1600_s4, %s755_s9  }
 0x1bd PF: > { %1142 = sdivrem.u32 %s1698_s27, 14 }
 0x1be   : > { %s911_s10 = smul.u32 112, %s1606_s20 }
 0x1c0   : > { %s763_s11 = scalar_lea.vmem %s1499_s12, %s911_s10 [#allocation2]   ;;  %s765_s14 = scalar_lea.vmem %s1600_s4, %s911_s10  }
 0x1c6   : > { %s1143_s17 = spop.drf %1142 }
 0x1c7   : > { %p913_p13 = scmp.le.s32.totalorder %s1143_s17, 0 }
 0x1c8   : > { %s1216_s18 = smov (!%p913_p13), %s765_s14   ;;  %s1220_s21 = smov (!%p913_p13), %s763_s11  }
 0x1c9   : > { %856 = sbr.rel (%p913_p13) target bundleno = 470 (0x1d6), region = 127  ;;  %s1224_s22 = smov (!%p913_p13), 0  }
 0x1ca   : > { %s1228_s23 = smov (!%p913_p13), 0  }
 0x1ce LB: >> { %v775_v21 = vld [vmem:[%s1222_s21] sm:$0xff]  ;;  %s777_s24 = sadd.s32 1, %s1226_s22  ;;  %s769_s23 = sadd.s32 1, %s1230_s23   ;;  %s1230_s23 = sphi %s1228_s23, %s769_s23   ;;  %s1226_s22 = sphi %s1224_s22, %s1225_s22   ;;  %s1222_s21 = sphi %s1220_s21, %s782_s21   ;;  %s1218_s18 = sphi %s1216_s18, %s783_s18  }
 0x1cf   : >> { %776 = vst [vmem:[%s1218_s18] sm:$0xff] %v775_v21  ;;  %p778_p0 = scmp.ge.s32.totalorder %s777_s24, %s1143_s17  ;;  %p768_p1 = scmp.ge.s32.totalorder %s769_s23, %s1143_s17 }
 0x1d1   : >> { %s1702_s24 = smov (%p778_p0, %s777_s24), 0  ;;  %771 = sbr.rel (!%p768_p1) target bundleno = 462 (0x1ce), region = 133 }
 0x1d2   : >> { %s914_s26 = sshll.u32 %s1702_s24, 3  ;;  %s1225_s22 = smov %s1702_s24  }
 0x1d3   : >> { %s782_s21 = scalar_lea.vmem %s763_s11, %s914_s26 [#allocation2]   ;;  %s783_s18 = scalar_lea.vmem %s765_s14, %s914_s26  }
 0x1d6 PF: > { %p10_p2 = scmp.ge.s32.totalorder %s1267_s16, 4   ;;  %s1694_s12 = smov %s1194_s13 }
 0x1d7   : > { %s1695_s13 = smov %s1275_s19  ;;  %s1696_s14 = smov %s1267_s16 }
 0x1d8   :  { %12 = sbr.rel (!%p10_p2) target bundleno = 2 (0x2), region = 144 }

</bundles_post_ra>
